<compile_context>
chip_gen: v7x
topology: tpu7x:2x2x1
jax: 0.10.0
libtpu: 0.0.40
codegen_flags: <defaults>
</compile_context>

<pallas_src>
import functools
import math

import numpy as np
import jax
import jax.numpy as jnp
from jax.experimental import pallas as pl
from jax.experimental.pallas import tpu as pltpu


def _interp_matrix_np(out_size: int, in_size: int) -> np.ndarray:
    """Dense (out_size, in_size) bilinear interp matrix (align_corners=False)."""
    i = np.arange(out_size, dtype=np.float64)
    scale = in_size / out_size
    src = np.clip((i + 0.5) * scale - 0.5, 0.0, float(in_size - 1))
    i0 = np.floor(src).astype(np.int64)
    i1 = np.minimum(i0 + 1, in_size - 1)
    w1 = src - i0
    w0 = 1.0 - w1
    m = np.zeros((out_size, in_size), np.float64)
    rows = np.arange(out_size)
    np.add.at(m, (rows, i0), w0)
    np.add.at(m, (rows, i1), w1)
    return m.astype(np.float32)


def _pick_tiling(nc, hin, hout, win, wout, itemsize):
    """Choose (tile_nc, k_bd): images per grid step / per block-diag GEMM."""
    sub = 8 if itemsize >= 4 else 16          # sublane alignment (f32 / bf16)
    # Images fused per block-diagonal height GEMM so contraction K ~= 128.
    k_bd = max(1, 128 // max(hin, 1))
    # Keep the block-diagonal weight matrix modest (<= ~2 MiB single-buffered).
    while k_bd > 1 and (k_bd * hout) * (k_bd * hin) * itemsize > (2 << 20):
        k_bd = max(1, k_bd // 2)
    # tile_nc must keep the output block's sublane dim (tile_nc*hout) aligned
    # and be a multiple of k_bd so groups tile the block exactly.
    mult_out = sub // math.gcd(hout, sub)
    unit = k_bd * mult_out // math.gcd(k_bd, mult_out)      # lcm(k_bd, mult_out)
    # VMEM budget (~8 MiB) for the double-buffered x/out pipeline blocks;
    # also bound the statically-unrolled per-step group loop.
    per_image = (hin * win + hout * wout) * itemsize * 2
    cap = max(unit, min(256, 16 * k_bd, (8 << 20) // max(per_image, 1)))
    cap = max(unit, (cap // unit) * unit)
    if nc <= cap:
        return -(-nc // unit) * unit, k_bd     # single grid step (pad nc up)
    # Prefer a comparable-size divisor of nc (no padding); otherwise pad.
    best_div, t = 0, unit
    while t <= cap:
        if nc % t == 0:
            best_div = t
        t += unit
    tile_nc = best_div if best_div * 2 >= cap else cap
    return tile_nc, k_bd


def _resize_kernel(x_ref, whbd_ref, wwt_ref, o_ref, *, k_bd, n_groups):
    # x_ref   : (tile_nc, Hin, Win)      tile of flattened (N*C) images
    # whbd_ref: (k_bd*Hout, k_bd*Hin)    block-diagonal height-interp weights
    # wwt_ref : (Win, Wout)              width-interp weights, pre-transposed
    # o_ref   : (tile_nc*Hout, Wout)     image-major output rows
    _, hin, win = x_ref.shape
    kh_out = whbd_ref.shape[0]           # k_bd * Hout
    whbd = whbd_ref[...]
    wwt = wwt_ref[...]
    for g in range(n_groups):            # static, unrolled
        xg = x_ref[pl.ds(g * k_bd, k_bd)].reshape(k_bd * hin, win)
        # Height interp: one GEMM with K = k_bd*Hin (~128), no broadcast.
        tmp = jnp.dot(whbd, xg, preferred_element_type=jnp.float32)
        # Width interp: (k_bd*Hout, Win) @ (Win, Wout).
        out = jnp.dot(tmp.astype(wwt.dtype), wwt,
                      preferred_element_type=jnp.float32)
        o_ref[pl.ds(g * kh_out, kh_out), :] = out.astype(o_ref.dtype)


@functools.partial(jax.jit, static_argnames=("factor",))
def resize_by_factor(x: jnp.ndarray, factor: float) -> jnp.ndarray:
    """Bilinear resize of an NCHW batch by `factor` using a Pallas TPU kernel."""
    N, C, Hin, Win = x.shape
    # PyTorch module: size = (int(dim0 * factor), int(dim1 * factor))
    Hout, Wout = int(Hin * factor), int(Win * factor)
    NC = N * C

    compute_dtype = (x.dtype if x.dtype in (jnp.bfloat16, jnp.float32)
                     else jnp.float32)
    itemsize = jnp.dtype(compute_dtype).itemsize

    tile_nc, k_bd = _pick_tiling(NC, Hin, Hout, Win, Wout, itemsize)
    n_groups = tile_nc // k_bd
    grid = -(-NC // tile_nc)
    NC_pad = grid * tile_nc

    # Interpolation weights: numpy constants at trace time (static shapes).
    wh = _interp_matrix_np(Hout, Hin)                          # (Hout, Hin)
    whbd_np = np.kron(np.eye(k_bd, dtype=np.float32), wh)      # block-diagonal
    wwt_np = np.ascontiguousarray(_interp_matrix_np(Wout, Win).T)  # (Win, Wout)
    whbd = jnp.asarray(whbd_np, dtype=compute_dtype)
    wwt = jnp.asarray(wwt_np, dtype=compute_dtype)

    x_flat = x.reshape(NC, Hin, Win)
    if NC_pad != NC:
        x_flat = jnp.pad(x_flat, ((0, NC_pad - NC), (0, 0), (0, 0)))

    flops = 2 * NC_pad * Hout * (k_bd * Hin * Win + Win * Wout)
    bytes_accessed = (NC_pad * (Hin * Win + Hout * Wout) * x.dtype.itemsize
                      + (whbd.size + wwt.size) * itemsize)

    kernel = functools.partial(_resize_kernel, k_bd=k_bd, n_groups=n_groups)

    out_flat = pl.pallas_call(
        kernel,
        out_shape=jax.ShapeDtypeStruct((NC_pad * Hout, Wout), x.dtype),
        grid_spec=pltpu.PrefetchScalarGridSpec(
            num_scalar_prefetch=0,
            grid=(grid,),
            in_specs=[
                # Batched image tile; last two dims equal the full (Hin, Win).
                pl.BlockSpec((tile_nc, Hin, Win), lambda i: (i, 0, 0)),
                # Grid-invariant interpolation weights (DMA'd once, reused).
                pl.BlockSpec(whbd.shape, lambda i: (0, 0)),
                pl.BlockSpec(wwt.shape, lambda i: (0, 0)),
            ],
            # Unpadded, image-major output rows; last dim equals full Wout.
            out_specs=pl.BlockSpec((tile_nc * Hout, Wout), lambda i: (i, 0)),
        ),
        compiler_params=pltpu.CompilerParams(
            dimension_semantics=("parallel",),
            vmem_limit_bytes=48 * 1024 * 1024,
        ),
        cost_estimate=pl.CostEstimate(
            flops=flops, transcendentals=0, bytes_accessed=bytes_accessed),
    )(x_flat, whbd, wwt)

    if NC_pad != NC:
        out_flat = out_flat[: NC * Hout]
    return out_flat.reshape(N, C, Hout, Wout)


def _reference_resize(x: jnp.ndarray, factor: float) -> jnp.ndarray:
    """Pure-JAX reference (same interpolation matrices, einsum)."""
    N, C, Hin, Win = x.shape
    Hout, Wout = int(Hin * factor), int(Win * factor)
    wh = jnp.asarray(_interp_matrix_np(Hout, Hin))
    ww = jnp.asarray(_interp_matrix_np(Wout, Win))
    return jnp.einsum("ph,nchw,qw->ncpq", wh, x.astype(jnp.float32), ww)


if __name__ == "__main__":
    key = jax.random.PRNGKey(0)
    # Small input consistent with an image patch: batch=2, channels=4, 16x16.
    x = jax.random.normal(key, (2, 4, 16, 16), dtype=jnp.float32)
    factor = 1.5  # -> 24x24 output

    out = jax.block_until_ready(resize_by_factor(x, factor))

    ref = _reference_resize(x, factor)
    assert out.shape == (2, 4, 24, 24), out.shape
    assert jnp.allclose(out.astype(jnp.float32), ref, atol=1e-4, rtol=1e-4), \
        "mismatch vs reference"

    print("KERNEL_OK")
</pallas_src>

<mosaic_0001>
module attributes {stable_mosaic.version = 11 : i64} {
  func.func @_resize_kernel(%arg0: i32, %arg1: memref<8x16x16xf32, #tpu.memory_space<vmem>>, %arg2: memref<192x128xf32, #tpu.memory_space<vmem>>, %arg3: memref<16x24xf32, #tpu.memory_space<vmem>>, %arg4: memref<192x24xf32, #tpu.memory_space<vmem>>) attributes {dimension_semantics = [#tpu.dimension_semantics<parallel>], iteration_bounds = array<i64: 1>, scalar_prefetch = 0 : i64, scratch_operands = 0 : i64, tpu.core_type = #tpu.core_type<tc>, window_params = [{transform_indices = @transform_0, window_bounds = array<i64: 8, 16, 16>}, {pipeline_mode = #tpu.pipeline_mode<synchronous>, transform_indices = @transform_1, window_bounds = array<i64: 192, 128>}, {pipeline_mode = #tpu.pipeline_mode<synchronous>, transform_indices = @transform_2, window_bounds = array<i64: 16, 24>}, {transform_indices = @transform_3, window_bounds = array<i64: 192, 24>}]} {
    %c0 = arith.constant 0 : index
    %c0_0 = arith.constant 0 : index
    %0 = vector.load %arg2[%c0, %c0_0] : memref<192x128xf32, #tpu.memory_space<vmem>>, vector<192x128xf32>
    %c0_1 = arith.constant 0 : index
    %c0_2 = arith.constant 0 : index
    %1 = vector.load %arg3[%c0_1, %c0_2] : memref<16x24xf32, #tpu.memory_space<vmem>>, vector<16x24xf32>
    %c0_3 = arith.constant 0 : index
    %c0_4 = arith.constant 0 : index
    %c0_5 = arith.constant 0 : index
    %2 = vector.load %arg1[%c0_3, %c0_4, %c0_5] : memref<8x16x16xf32, #tpu.memory_space<vmem>>, vector<8x16x16xf32>
    %3 = vector.shape_cast %2 : vector<8x16x16xf32> to vector<128x16xf32>
    %cst = arith.constant dense<0.000000e+00> : vector<192x16xf32>
    %4 = tpu.matmul %0, %3, %cst {dimension_numbers = #tpu.dot_dimension_numbers<[1], [0], [0], [1], [0, 0, 1, 1], [], []>} : vector<192x128xf32>, vector<128x16xf32>, vector<192x16xf32> -> vector<192x16xf32>
    %cst_6 = arith.constant dense<0.000000e+00> : vector<192x24xf32>
    %5 = tpu.matmul %4, %1, %cst_6 {dimension_numbers = #tpu.dot_dimension_numbers<[1], [0], [0], [1], [0, 0, 1, 1], [], []>} : vector<192x16xf32>, vector<16x24xf32>, vector<192x24xf32> -> vector<192x24xf32>
    %c0_7 = arith.constant 0 : index
    %c0_8 = arith.constant 0 : index
    %6 = vector.load %arg4[%c0_7, %c0_8] : memref<192x24xf32, #tpu.memory_space<vmem>>, vector<192x24xf32>
    tpu.vector_store %arg4[%c0_7, %c0_8], %5 {strides = array<i32>} : memref<192x24xf32, #tpu.memory_space<vmem>>, vector<192x24xf32>,
    return
  }
  func.func @transform_0(%arg0: i32) -> (i32, i32, i32) {
    %c0_i32 = arith.constant 0 : i32
    %c0_i32_0 = arith.constant 0 : i32
    %c0_i32_1 = arith.constant 0 : i32
    return %arg0, %c0_i32, %c0_i32_0 : i32, i32, i32
  }
  func.func @transform_1(%arg0: i32) -> (i32, i32) {
    %c0_i32 = arith.constant 0 : i32
    %c0_i32_0 = arith.constant 0 : i32
    %c0_i32_1 = arith.constant 0 : i32
    return %c0_i32, %c0_i32_0 : i32, i32
  }
  func.func @transform_2(%arg0: i32) -> (i32, i32) {
    %c0_i32 = arith.constant 0 : i32
    %c0_i32_0 = arith.constant 0 : i32
    %c0_i32_1 = arith.constant 0 : i32
    return %c0_i32, %c0_i32_0 : i32, i32
  }
  func.func @transform_3(%arg0: i32) -> (i32, i32) {
    %c0_i32 = arith.constant 0 : i32
    %c0_i32_0 = arith.constant 0 : i32
    return %arg0, %c0_i32 : i32, i32
  }
}

</mosaic_0001>

<bundles_post_ra>
// kernel: resize_by_factor.1
= control target key start
LH: loop header
LB: loop body
LE: loop exit
PB: predicated region body
PF: predicated region fallthrough
CT: control target
= control target key end

     0   :  { %8 = vsyncpa [#allocation3], 0  ;;  %s1059_s0 = inlined_call_operand.hbm [shape: f32[8,16,16], index: 0, kind: input, shape index: {}]   ;;  %s1060_s1 = inlined_call_operand.hbm [shape: f32[192,128], index: 1, kind: input, shape index: {}]   ;;  %s1061_s2 = inlined_call_operand.hbm [shape: f32[16,24], index: 2, kind: input, shape index: {}]   ;;  %s1062_s3 = inlined_call_operand.hbm [shape: f32[192,24], index: 3, kind: output, shape index: {}]  }
   0x1   :  { %9 = vsyncpa [#allocation6], 0 }
   0x2   :  { %10 = vsyncpa [#allocation4], 0  ;;  %s918_s12 = smov [#allocation5]   ;;  %s919_s14 = smov [#allocation2]  }
   0x3   :  { %s28_s13 = sshll.u32 %s918_s12, 4  ;;  %s16_s15 = sshll.u32 %s919_s14, 4  ;;  %s29_s13 = int_to_ptr.vmem [resolvable:$true] %s28_s13  ;;  %s944_s15 = int_to_ptr.vmem [resolvable:$true] %s16_s15 }
   0x4   :  { %s824_s18 = scalar_lea.hbm %s1060_s1, 3072 }
   0x5   :  { %p825_p0 = scmp.ne.s32.totalorder %s1060_s1, %s824_s18  ;;  %p828_p1 = scmp.lt.u32.totalorder %s824_s18, %s1060_s1 }
   0x7   :  { %p830_p2 = pnand %p828_p1, %p825_p0 }
   0x9   :  { %833 = shalt.err (!%p830_p2)
}
   0xa   :  { %s834_s23 = scalar_lea.vmem %s29_s13, 3072  ;;  %p839_p4 = scmp.lt.s32.totalorder %s29_s13, %s29_s13 }
   0xb   :  { %p835_p3 = scmp.ne.s32.totalorder %s29_s13, %s834_s23  ;;  %p840_p5 = scmp.lt.s32.totalorder %s834_s23, %s834_s23 }
   0xd   :  { %p841_p6 = por %p840_p5, %p839_p4 }
   0xf   :  { %p842_p7 = pnand %p841_p6, %p835_p3 }
  0x11   :  { %845 = shalt.err (!%p842_p7)
}
  0x12   :  { %s920_s24 = smov 128   ;;  %s921_s25 = smov 8  }
  0x13   :  { %34 = dma.hbm_to_vmem [thread:$0]  %s1060_s1, 3072, %s29_s13, [#allocation6], %s920_s24, %s920_s24, %s921_s25  }
  0x14   :  { %s846_s30 = scalar_lea.hbm %s1059_s0, 2048 }
  0x15   :  { %p847_p8 = scmp.ne.s32.totalorder %s1059_s0, %s846_s30  ;;  %p850_p9 = scmp.lt.u32.totalorder %s846_s30, %s1059_s0 }
  0x17   :  { %p852_p10 = pnand %p850_p9, %p847_p8 }
  0x19   :  { %855 = shalt.err (!%p852_p10)
}
  0x1a   :  { %s856_s8 = scalar_lea.vmem %s944_s15, 2048  ;;  %p861_p12 = scmp.lt.s32.totalorder %s944_s15, %s944_s15 }
  0x1b   :  { %p857_p11 = scmp.ne.s32.totalorder %s944_s15, %s856_s8  ;;  %p862_p13 = scmp.lt.s32.totalorder %s856_s8, %s856_s8 }
  0x1d   :  { %p863_p0 = por %p862_p13, %p861_p12 }
  0x1f   :  { %p864_p1 = pnand %p863_p0, %p857_p11 }
  0x21   :  { %867 = shalt.err (!%p864_p1)
}
  0x22   :  { %22 = dma.hbm_to_vmem [thread:$0]  %s1059_s0, 2048, %s944_s15, [#allocation3], %s920_s24, %s920_s24, %s921_s25  }
  0x23   :  { %s922_s10 = smov [#allocation7]   ;;  %s868_s14 = scalar_lea.hbm %s1061_s2, 256 }
  0x24   :  { %s40_s11 = sshll.u32 %s922_s10, 4  ;;  %p869_p2 = scmp.ne.s32.totalorder %s1061_s2, %s868_s14  ;;  %s41_s11 = int_to_ptr.vmem [resolvable:$true] %s40_s11 }
  0x25   :  { %p872_p3 = scmp.lt.u32.totalorder %s868_s14, %s1061_s2 }
  0x27   :  { %p874_p4 = pnand %p872_p3, %p869_p2 }
  0x29   :  { %877 = shalt.err (!%p874_p4)
}
  0x2a   :  { %s878_s20 = scalar_lea.vmem %s41_s11, 256  ;;  %p883_p6 = scmp.lt.s32.totalorder %s41_s11, %s41_s11 }
  0x2b   :  { %p879_p5 = scmp.ne.s32.totalorder %s41_s11, %s878_s20  ;;  %p884_p7 = scmp.lt.s32.totalorder %s878_s20, %s878_s20 }
  0x2d   :  { %p885_p8 = por %p884_p7, %p883_p6 }
  0x2f   :  { %p886_p9 = pnand %p885_p8, %p879_p5 }
  0x31   :  { %889 = shalt.err (!%p886_p9)
}
  0x32   :  { %46 = dma.hbm_to_vmem [thread:$0]  %s1061_s2, 256, %s41_s11, [#allocation6], %s920_s24, %s920_s24, %s921_s25  }
  0x33   :  { %912 = dma.done.wait [#allocation3], 2048  }
  0x34   :  { %913 = vsyncadd [#allocation3], 4294965248 }
  0x35   :  { %914 = dma.done.wait [#allocation6], 3328  }
  0x36   :  { %915 = vsyncadd [#allocation6], 4294963968  ;;  %v82_v0 = vld [vmem:[#allocation2] sm:$0xff]  ;;  %v83_v1 = vld [vmem:[#allocation2 + $0x8] sm:$0xff]  ;;  %vm283_vm0 = vcmask 130048   ;;  %vm541_vm1 = vcmask 195584  }
  0x37   :  { %v84_v2 = vld [vmem:[#allocation2 + $0x10] sm:$0xff]  ;;  %v782_v3 = vpack.c.bf16 %v83_v1, %v82_v0  ;;  %v85_v4 = vld [vmem:[#allocation2 + $0x18] sm:$0xff]  ;;  %v86_v6 = vld [vmem:[#allocation2 + $0x20] sm:$0xff]  ;;  %s923_s2 = smov [#allocation8]  }
  0x38   :  { %v786_v5 = vpack.c.bf16 %v85_v4, %v84_v2  ;;  %v87_v7 = vld [vmem:[#allocation2 + $0x28] sm:$0xff]  ;;  %v56_v9 = vld [vmem:[#allocation5] sm:$0xff]  ;;  %v88_v10 = vld [vmem:[#allocation2 + $0x30] sm:$0xff]  ;;  %s571_s21 = sshll.u32 %s923_s2, 4  ;;  %s572_s21 = int_to_ptr.vmem [resolvable:$true] %s571_s21 }
  0x39   :  { %783 = vmatprep.subr.bf16.mxu0 %v782_v3  ;;  %v790_v8 = vpack.c.bf16 %v87_v7, %v86_v6  ;;  %v89_v11 = vld [vmem:[#allocation2 + $0x38] sm:$0xff]  ;;  %706 = vmatprep.mubr.f32.mxu0 %v56_v9  ;;  %v90_v13 = vld [vmem:[#allocation2 + $0x40] sm:$0xff]  ;;  %v91_v14 = vld [vmem:[#allocation2 + $0x48] sm:$0xff]  ;;  %s890_s22 = scalar_lea.vmem %s572_s21, 3072  ;;  %p895_p11 = scmp.lt.s32.totalorder %s572_s21, %s572_s21 }
  0x3a   :  { %785 = vmatpush3.bf16.msra.mxu0 %v782_v3  ;;  %v794_v12 = vpack.c.bf16 %v89_v11, %v88_v10  ;;  %v798_v15 = vpack.c.bf16 %v91_v14, %v90_v13  ;;  %v80_v16 = vld [vmem:[#allocation7] sm:$0xff]  ;;  %v81_v17 = vld [vmem:[#allocation7 + $0x8] sm:$0xff]  ;;  %v92_v18 = vld [vmem:[#allocation2 + $0x50] sm:$0xff]  ;;  %p891_p10 = scmp.ne.s32.totalorder %s572_s21, %s890_s22  ;;  %p896_p12 = scmp.lt.s32.totalorder %s890_s22, %s890_s22 }
  0x3b   :  { %787 = vmatprep.subr.bf16.mxu0 %v786_v5  ;;  %v93_v19 = vld [vmem:[#allocation2 + $0x58] sm:$0xff]  ;;  %v814_v20 = vpack.c.bf16 %v81_v17, %v80_v16  ;;  %v94_v22 = vld [vmem:[#allocation2 + $0x60] sm:$0xff]  ;;  %v95_v23 = vld [vmem:[#allocation2 + $0x68] sm:$0xff] }
  0x3c   :  { %v802_v21 = vpack.c.bf16 %v93_v19, %v92_v18  ;;  %v806_v24 = vpack.c.bf16 %v95_v23, %v94_v22  ;;  %v96_v25 = vld [vmem:[#allocation2 + $0x70] sm:$0xff]  ;;  %v97_v26 = vld [vmem:[#allocation2 + $0x78] sm:$0xff]  ;;  %v57_v28 = vld [vmem:[#allocation5 + $0x8] sm:$0xff]  ;;  %p897_p13 = por %p896_p12, %p895_p11 }
  0x3d   :  { %815 = vmatprep.subr.bf16.mxu1 %v814_v20  ;;  %v810_v27 = vpack.c.bf16 %v97_v26, %v96_v25  ;;  %v58_v29 = vld [vmem:[#allocation5 + $0x10] sm:$0xff]  ;;  %v59_v30 = vld [vmem:[#allocation5 + $0x18] sm:$0xff]  ;;  %v60_v31 = vld [vmem:[#allocation5 + $0x20] sm:$0xff] }
  0x3e   :  { %789 = vmatpush3.bf16.msra.mxu0 %v786_v5  ;;  %817 = vmatpush3.bf16.msra.mxu1 %v814_v20  ;;  %v61_v32 = vld [vmem:[#allocation5 + $0x28] sm:$0xff]  ;;  %v62_v33 = vld [vmem:[#allocation5 + $0x30] sm:$0xff]  ;;  %v63_v34 = vld [vmem:[#allocation5 + $0x38] sm:$0xff]  ;;  %p898_p0 = pnand %p897_p13, %p891_p10 }
  0x3f   :  { %791 = vmatprep.subr.bf16.mxu0 %v790_v8  ;;  %v64_v35 = vld [vmem:[#allocation5 + $0x40] sm:$0xff]  ;;  %v65_v36 = vld [vmem:[#allocation5 + $0x48] sm:$0xff]  ;;  %v66_v37 = vld [vmem:[#allocation5 + $0x50] sm:$0xff] }
  0x40   :  { %v67_v38 = vld [vmem:[#allocation5 + $0x58] sm:$0xff]  ;;  %v68_v39 = vld [vmem:[#allocation5 + $0x60] sm:$0xff]  ;;  %v69_v40 = vld [vmem:[#allocation5 + $0x68] sm:$0xff] }
  0x41   :  { %v70_v41 = vld [vmem:[#allocation5 + $0x70] sm:$0xff]  ;;  %v71_v42 = vld [vmem:[#allocation5 + $0x78] sm:$0xff]  ;;  %v72_v43 = vld [vmem:[#allocation5 + $0x80] sm:$0xff] }
  0x42   :  { %793 = vmatpush3.bf16.msra.mxu0 %v790_v8  ;;  %v73_v44 = vld [vmem:[#allocation5 + $0x88] sm:$0xff]  ;;  %v74_v45 = vld [vmem:[#allocation5 + $0x90] sm:$0xff]  ;;  %v75_v46 = vld [vmem:[#allocation5 + $0x98] sm:$0xff] }
  0x43   :  { %795 = vmatprep.subr.bf16.mxu0 %v794_v12  ;;  %v76_v47 = vld [vmem:[#allocation5 + $0xa0] sm:$0xff]  ;;  %v77_v48 = vld [vmem:[#allocation5 + $0xa8] sm:$0xff]  ;;  %v78_v49 = vld [vmem:[#allocation5 + $0xb0] sm:$0xff] }
  0x44   :  { %v79_v50 = vld [vmem:[#allocation5 + $0xb8] sm:$0xff] }
  0x46   :  { %797 = vmatpush3.bf16.msra.mxu0 %v794_v12 }
  0x47   :  { %799 = vmatprep.subr.bf16.mxu0 %v798_v15 }
  0x4a   :  { %801 = vmatpush3.bf16.msra.mxu0 %v798_v15 }
  0x4b   :  { %803 = vmatprep.subr.bf16.mxu0 %v802_v21 }
  0x4e   :  { %805 = vmatpush3.bf16.msra.mxu0 %v802_v21 }
  0x4f   :  { %807 = vmatprep.subr.bf16.mxu0 %v806_v24 }
  0x52   :  { %809 = vmatpush3.bf16.msra.mxu0 %v806_v24 }
  0x53   :  { %811 = vmatprep.subr.bf16.mxu0 %v810_v27 }
  0x56   :  { %813 = vmatpush3.bf16.msra.mxu0 %v810_v27 }
  0x59   :  { %707 = vmatmul.mubr.f32.vlgmr.msra.gmra.mrb[0].mxu0 %v57_v28 }
  0x5a   :  { %709 = vmatprep.mubr.f32.mxu0 %v58_v29 }
  0x5d   :  { %710 = vmatmul.mubr.f32.gmra.mrb[2].mxu0 %v59_v30 }
  0x5e   :  { %712 = vmatprep.mubr.f32.mxu0 %v60_v31 }
  0x61   :  { %713 = vmatmul.mubr.f32.gmra.mrb[4].mxu0 %v61_v32 }
  0x62   :  { %715 = vmatprep.mubr.f32.mxu0 %v62_v33 }
  0x65   :  { %716 = vmatmul.mubr.f32.gmra.mrb[6].mxu0 %v63_v34 }
  0x66   :  { %718 = vmatprep.mubr.f32.mxu0 %v64_v35 }
  0x69   :  { %719 = vmatmul.mubr.f32.gmra.mrb[8].mxu0 %v65_v36 }
  0x6a   :  { %721 = vmatprep.mubr.f32.mxu0 %v66_v37 }
  0x6d   :  { %722 = vmatmul.mubr.f32.gmra.mrb[10].mxu0 %v67_v38 }
  0x6e   :  { %724 = vmatprep.mubr.f32.mxu0 %v68_v39 }
  0x71   :  { %725 = vmatmul.mubr.f32.gmra.mrb[12].mxu0 %v69_v40 }
  0x72   :  { %727 = vmatprep.mubr.f32.mxu0 %v70_v41 }
  0x75   :  { %728 = vmatmul.mubr.f32.gmra.mrb[14].mxu0 %v71_v42 }
  0x76   :  { %730 = vmatprep.mubr.f32.mxu0 %v72_v43 }
  0x79   :  { %731 = vmatmul.mubr.f32.gmra.mrb[16].mxu0 %v73_v44 }
  0x7a   :  { %733 = vmatprep.mubr.f32.mxu0 %v74_v45 }
  0x7d   :  { %734 = vmatmul.mubr.f32.gmra.mrb[18].mxu0 %v75_v46 }
  0x7e   :  { %736 = vmatprep.mubr.f32.mxu0 %v76_v47 }
  0x81   :  { %737 = vmatmul.mubr.f32.gmra.mrb[20].mxu0 %v77_v48 }
  0x82   :  { %739 = vmatprep.mubr.f32.mxu0 %v78_v49 }
  0x85   :  { %740 = vmatmul.mubr.f32.gmra.mrb[22].mxu0 %v79_v50 }
 0x12c   :  { %v708_v51 = vpop.f32.mrb[0].mxu0 }
 0x12d   :  { %v164_v52 = vpop.f32.mrb[1].mxu0 }
 0x12e   :  { %746 = vmatprep.mubr.msk.f32.mxu1 %vm283_vm0, %v164_v52 }
 0x12f   :  { %747 = vmatmul.mubr.msk.f32.vlgmr.msra.gmra.mrb[0].mxu1 %vm283_vm0, %v708_v51 }
 0x130   :  { %v711_v53 = vpop.f32.mrb[2].mxu0 }
 0x131   :  { %v174_v54 = vpop.f32.mrb[3].mxu0 }
 0x132   :  { %749 = vmatprep.mubr.msk.f32.mxu1 %vm283_vm0, %v174_v54 }
 0x133   :  { %750 = vmatmul.mubr.msk.f32.gmra.mrb[2].mxu1 %vm283_vm0, %v711_v53 }
 0x134   :  { %v714_v55 = vpop.f32.mrb[4].mxu0 }
 0x135   :  { %v184_v56 = vpop.f32.mrb[5].mxu0 }
 0x136   :  { %752 = vmatprep.mubr.msk.f32.mxu1 %vm283_vm0, %v184_v56 }
 0x137   :  { %753 = vmatmul.mubr.msk.f32.gmra.mrb[4].mxu1 %vm283_vm0, %v714_v55 }
 0x138   :  { %v717_v57 = vpop.f32.mrb[6].mxu0 }
 0x139   :  { %v194_v58 = vpop.f32.mrb[7].mxu0 }
 0x13a   :  { %755 = vmatprep.mubr.msk.f32.mxu1 %vm283_vm0, %v194_v58 }
 0x13b   :  { %756 = vmatmul.mubr.msk.f32.gmra.mrb[6].mxu1 %vm283_vm0, %v717_v57 }
 0x13c   :  { %v720_v59 = vpop.f32.mrb[8].mxu0 }
 0x13d   :  { %v204_v60 = vpop.f32.mrb[9].mxu0 }
 0x13e   :  { %758 = vmatprep.mubr.msk.f32.mxu1 %vm283_vm0, %v204_v60 }
 0x13f   :  { %759 = vmatmul.mubr.msk.f32.gmra.mrb[8].mxu1 %vm283_vm0, %v720_v59 }
 0x140   :  { %v723_v61 = vpop.f32.mrb[10].mxu0 }
 0x141   :  { %v214_v62 = vpop.f32.mrb[11].mxu0 }
 0x142   :  { %761 = vmatprep.mubr.msk.f32.mxu1 %vm283_vm0, %v214_v62 }
 0x143   :  { %762 = vmatmul.mubr.msk.f32.gmra.mrb[10].mxu1 %vm283_vm0, %v723_v61 }
 0x144   :  { %v726_v63 = vpop.f32.mrb[12].mxu0 }
 0x145   :  { %v224_v0 = vpop.f32.mrb[13].mxu0 }
 0x146   :  { %764 = vmatprep.mubr.msk.f32.mxu1 %vm283_vm0, %v224_v0 }
 0x147   :  { %765 = vmatmul.mubr.msk.f32.gmra.mrb[12].mxu1 %vm283_vm0, %v726_v63 }
 0x148   :  { %v729_v1 = vpop.f32.mrb[14].mxu0 }
 0x149   :  { %v234_v2 = vpop.f32.mrb[15].mxu0 }
 0x14a   :  { %767 = vmatprep.mubr.msk.f32.mxu1 %vm283_vm0, %v234_v2 }
 0x14b   :  { %768 = vmatmul.mubr.msk.f32.gmra.mrb[14].mxu1 %vm283_vm0, %v729_v1 }
 0x14c   :  { %v732_v3 = vpop.f32.mrb[16].mxu0 }
 0x14d   :  { %v244_v4 = vpop.f32.mrb[17].mxu0 }
 0x14e   :  { %770 = vmatprep.mubr.msk.f32.mxu1 %vm283_vm0, %v244_v4 }
 0x14f   :  { %771 = vmatmul.mubr.msk.f32.gmra.mrb[16].mxu1 %vm283_vm0, %v732_v3 }
 0x150   :  { %v735_v5 = vpop.f32.mrb[18].mxu0 }
 0x151   :  { %v254_v6 = vpop.f32.mrb[19].mxu0 }
 0x152   :  { %773 = vmatprep.mubr.msk.f32.mxu1 %vm283_vm0, %v254_v6 }
 0x153   :  { %774 = vmatmul.mubr.msk.f32.gmra.mrb[18].mxu1 %vm283_vm0, %v735_v5 }
 0x154   :  { %v738_v7 = vpop.f32.mrb[20].mxu0 }
 0x155   :  { %v264_v8 = vpop.f32.mrb[21].mxu0 }
 0x156   :  { %776 = vmatprep.mubr.msk.f32.mxu1 %vm283_vm0, %v264_v8 }
 0x157   :  { %777 = vmatmul.mubr.msk.f32.gmra.mrb[20].mxu1 %vm283_vm0, %v738_v7 }
 0x158   :  { %v741_v9 = vpop.f32.mrb[22].mxu0 }
 0x159   :  { %v274_v10 = vpop.f32.mrb[23].mxu0 }
 0x15a   :  { %779 = vmatprep.mubr.msk.f32.mxu1 %vm283_vm0, %v274_v10 }
 0x15b   :  { %780 = vmatmul.mubr.msk.f32.gmra.mrb[22].mxu1 %vm283_vm0, %v741_v9 }
 0x202   :  { %v748_v11 = vpop.f32.mrb[0].mxu1 }
 0x203   :  { %543 = vst.msk [vmem:[#allocation8 + $0x8] sm:$0xff] %vm541_vm1, %v748_v11  ;;  %v422_v12 = vpop.f32.mrb[1].mxu1 }
 0x204   :  { %542 = vst.msk [vmem:[#allocation8] sm:$0xff] %vm541_vm1, %v422_v12 }
 0x206   :  { %v751_v13 = vpop.f32.mrb[2].mxu1 }
 0x207   :  { %545 = vst.msk [vmem:[#allocation8 + $0x18] sm:$0xff] %vm541_vm1, %v751_v13  ;;  %v432_v14 = vpop.f32.mrb[3].mxu1 }
 0x208   :  { %544 = vst.msk [vmem:[#allocation8 + $0x10] sm:$0xff] %vm541_vm1, %v432_v14 }
 0x20a   :  { %v754_v15 = vpop.f32.mrb[4].mxu1 }
 0x20b   :  { %547 = vst.msk [vmem:[#allocation8 + $0x28] sm:$0xff] %vm541_vm1, %v754_v15  ;;  %v442_v16 = vpop.f32.mrb[5].mxu1 }
 0x20c   :  { %546 = vst.msk [vmem:[#allocation8 + $0x20] sm:$0xff] %vm541_vm1, %v442_v16 }
 0x20e   :  { %v757_v17 = vpop.f32.mrb[6].mxu1 }
 0x20f   :  { %549 = vst.msk [vmem:[#allocation8 + $0x38] sm:$0xff] %vm541_vm1, %v757_v17  ;;  %v452_v18 = vpop.f32.mrb[7].mxu1 }
 0x210   :  { %548 = vst.msk [vmem:[#allocation8 + $0x30] sm:$0xff] %vm541_vm1, %v452_v18 }
 0x212   :  { %v760_v19 = vpop.f32.mrb[8].mxu1 }
 0x213   :  { %551 = vst.msk [vmem:[#allocation8 + $0x48] sm:$0xff] %vm541_vm1, %v760_v19  ;;  %v462_v20 = vpop.f32.mrb[9].mxu1 }
 0x214   :  { %550 = vst.msk [vmem:[#allocation8 + $0x40] sm:$0xff] %vm541_vm1, %v462_v20 }
 0x216   :  { %v763_v21 = vpop.f32.mrb[10].mxu1 }
 0x217   :  { %553 = vst.msk [vmem:[#allocation8 + $0x58] sm:$0xff] %vm541_vm1, %v763_v21  ;;  %v472_v22 = vpop.f32.mrb[11].mxu1 }
 0x218   :  { %552 = vst.msk [vmem:[#allocation8 + $0x50] sm:$0xff] %vm541_vm1, %v472_v22 }
 0x21a   :  { %v766_v23 = vpop.f32.mrb[12].mxu1 }
 0x21b   :  { %555 = vst.msk [vmem:[#allocation8 + $0x68] sm:$0xff] %vm541_vm1, %v766_v23  ;;  %v482_v24 = vpop.f32.mrb[13].mxu1 }
 0x21c   :  { %554 = vst.msk [vmem:[#allocation8 + $0x60] sm:$0xff] %vm541_vm1, %v482_v24 }
 0x21e   :  { %v769_v25 = vpop.f32.mrb[14].mxu1 }
 0x21f   :  { %557 = vst.msk [vmem:[#allocation8 + $0x78] sm:$0xff] %vm541_vm1, %v769_v25  ;;  %v492_v26 = vpop.f32.mrb[15].mxu1 }
 0x220   :  { %556 = vst.msk [vmem:[#allocation8 + $0x70] sm:$0xff] %vm541_vm1, %v492_v26 }
 0x222   :  { %v772_v27 = vpop.f32.mrb[16].mxu1 }
 0x223   :  { %559 = vst.msk [vmem:[#allocation8 + $0x88] sm:$0xff] %vm541_vm1, %v772_v27  ;;  %v502_v28 = vpop.f32.mrb[17].mxu1 }
 0x224   :  { %558 = vst.msk [vmem:[#allocation8 + $0x80] sm:$0xff] %vm541_vm1, %v502_v28 }
 0x226   :  { %v775_v29 = vpop.f32.mrb[18].mxu1 }
 0x227   :  { %561 = vst.msk [vmem:[#allocation8 + $0x98] sm:$0xff] %vm541_vm1, %v775_v29  ;;  %v512_v30 = vpop.f32.mrb[19].mxu1 }
 0x228   :  { %560 = vst.msk [vmem:[#allocation8 + $0x90] sm:$0xff] %vm541_vm1, %v512_v30 }
 0x22a   :  { %v778_v31 = vpop.f32.mrb[20].mxu1 }
 0x22b   :  { %563 = vst.msk [vmem:[#allocation8 + $0xa8] sm:$0xff] %vm541_vm1, %v778_v31  ;;  %v522_v32 = vpop.f32.mrb[21].mxu1 }
 0x22c   :  { %562 = vst.msk [vmem:[#allocation8 + $0xa0] sm:$0xff] %vm541_vm1, %v522_v32 }
 0x22e   :  { %v781_v33 = vpop.f32.mrb[22].mxu1 }
 0x22f   :  { %565 = vst.msk [vmem:[#allocation8 + $0xb8] sm:$0xff] %vm541_vm1, %v781_v33  ;;  %v532_v34 = vpop.f32.mrb[23].mxu1 }
 0x230   :  { %564 = vst.msk [vmem:[#allocation8 + $0xb0] sm:$0xff] %vm541_vm1, %v532_v34 }
 0x231   :  { %901 = shalt.err (!%p898_p0)
}
 0x232   :  { %s902_s27 = scalar_lea.hbm %s1062_s3, 3072 }
 0x233   :  { %p903_p1 = scmp.ne.s32.totalorder %s1062_s3, %s902_s27  ;;  %p906_p2 = scmp.lt.u32.totalorder %s902_s27, %s1062_s3 }
 0x235   :  { %p908_p3 = pnand %p906_p2, %p903_p1 }
 0x237   :  { %911 = shalt.err (!%p908_p3)
}
 0x238   :  { %577 = dma.vmem_to_hbm [thread:$0]  %s572_s21, 3072, %s1062_s3, [#allocation4], %s920_s24, %s920_s24, %s921_s25  }
 0x239   :  { %916 = dma.done.wait [#allocation4], 3072  }
 0x23a   :  { %917 = vsyncadd [#allocation4], 4294964224 }
 0x23b   :  { %581 = vsyncpa [#allocation3], 1 }
 0x23c   :  { %582 = vsyncpa [#allocation6], 1 }
 0x23d   :  { %583 = vsyncpa [#allocation4], 1 }

</bundles_post_ra>
